<compile_context>
chip_gen: v5e
topology: v5e:2x2
jax: 0.10.0
libtpu: 0.0.40
codegen_flags: <defaults>
</compile_context>

<pallas_src>
import functools

import jax
import jax.numpy as jnp
from jax.experimental import pallas as pl
from jax.experimental.pallas import tpu as pltpu


def _transition_kernel(x_ref, w1_ref, w2_ref, vec_ref, ssn_ref, o_ref,
                       fpad_ref, zpad_ref, *, cout, dilation):
    Nb, F_, TCin = x_ref.shape
    M = o_ref.shape[-1]                       # T * Cout (merged time-chan axis)
    dC = dilation * cout                      # merged-axis shift of d time steps
    P = (zpad_ref.shape[-1] - M) // 2         # lane-aligned pad width (>= dC)
    V = vec_ref[...]                          # (9, M) f32 per-channel vectors

    # ---- f2: 1x1 conv (+BatchNorm1, scale folded into w1 columns) + ReLU ----
    # bf16 x bf16 MXU operands, f32 accumulation.
    x = x_ref[...]
    y = jnp.dot(x.reshape(Nb * F_, TCin), w1_ref[...],
                preferred_element_type=jnp.float32)
    y = y.reshape(Nb, F_, M)
    y = jnp.maximum(y + V[0], 0.0)            # conv1 bias + BN1 shift, ReLU

    # ---- depthwise (3,1) "same" conv over frequency --------------------------
    # Zero-padded VMEM scratch; three taps are static shifted sublane slices.
    # Pad rows are re-zeroed every step (megacore-safe, see file header).
    fpad_ref[:, 0:1, :] = jnp.zeros((Nb, 1, M), jnp.float32)
    fpad_ref[:, F_ + 1:F_ + 2, :] = jnp.zeros((Nb, 1, M), jnp.float32)
    fpad_ref[:, 1:F_ + 1, :] = y
    y = (V[1] * fpad_ref[:, 0:F_, :]
         + V[2] * fpad_ref[:, 1:F_ + 1, :]
         + V[3] * fpad_ref[:, 2:F_ + 2, :])

    # ---- SubSpectralNorm (eval); freq depthwise bias folded into the shift ---
    ssn = ssn_ref[...]                        # (2, F, M)
    y = y * ssn[0] + ssn[1]

    # ---- f1 on the frequency mean --------------------------------------------
    z = jnp.mean(y, axis=1)                   # (Nb, M)
    # Depthwise (1,3) dilated "same" time conv + BatchNorm3 (folded): realized
    # as shifted lane windows of a tiny zero-padded VMEM row (replaces the
    # former (M, M) banded weight matrix; no quadratic HBM/VMEM weight bytes).
    zpad_ref[...] = jnp.zeros_like(zpad_ref)
    zpad_ref[:, P:P + M] = z                  # lane-aligned store
    z = (V[4] * zpad_ref[:, P - dC:P - dC + M]      # z[t - d]
         + V[5] * z                                 # z[t]
         + V[6] * zpad_ref[:, P + dC:P + dC + M]    # z[t + d]
         ) + V[7]                                   # time bias (+BN3 shift)
    z = z * jax.nn.sigmoid(z)                 # SiLU
    # 1x1 conv as a block-diagonal matmul (bf16 MXU operands, f32 acc).
    # Dropout2d is the identity in eval mode.
    z = jnp.dot(z.astype(w2_ref.dtype), w2_ref[...],
                preferred_element_type=jnp.float32) + V[8]

    # ---- residual add (broadcast over frequency) + ReLU; lane-dense store ----
    o_ref[...] = jnp.maximum(y + z[:, None, :], 0.0).astype(o_ref.dtype)


def _pack_params(params, n_time):
    """Host-side prep: fold eval-mode BatchNorm constants and lift the two 1x1
    convolutions onto the merged time*channel axis as block-diagonal bf16
    matrices.  Per-channel vectors stay f32 (VPU math stays f32 in-kernel)."""
    T = n_time
    bn1_s = params["bn1_s"].reshape(-1)
    bn1_b = params["bn1_b"].reshape(-1)
    bn3_s = params["bn3_s"].reshape(-1)
    bn3_b = params["bn3_b"].reshape(-1)
    b1 = params["b1"].reshape(-1)
    b2 = params["b2"].reshape(-1)
    dwf_b = params["dwf_b"].reshape(-1)
    dwt_b = params["dwt_b"].reshape(-1)

    eye_t = jnp.eye(T, dtype=jnp.float32)
    # 1x1 convs lifted to the merged axis (block diagonal, T copies).
    # BN1 scale folded into the columns of w1 (drops a full-tile VPU multiply).
    w1_eff = params["w1"].astype(jnp.float32) * bn1_s[None, :]
    w1_big = jnp.kron(eye_t, w1_eff).astype(jnp.bfloat16)       # (T*Cin, T*Cout)
    w2_big = jnp.kron(eye_t, params["w2"].astype(jnp.float32)
                      ).astype(jnp.bfloat16)                    # (T*Cout, T*Cout)

    def tile(v):                                                # (Cout,)->(T*Cout,)
        return jnp.tile(v.reshape(-1), T)

    wt = params["dwt_w"] * bn3_s[None, :]                       # time taps (+BN3)
    vec = jnp.stack([
        tile(b1 * bn1_s + bn1_b),                               # 0: conv1 bias+BN1
        tile(params["dwf_w"][0]),                               # 1: freq tap f-1
        tile(params["dwf_w"][1]),                               # 2: freq tap f
        tile(params["dwf_w"][2]),                               # 3: freq tap f+1
        tile(wt[0]), tile(wt[1]), tile(wt[2]),                  # 4-6: time taps
        tile(dwt_b * bn3_s + bn3_b),                            # 7: time bias+BN3
        tile(b2),                                               # 8: conv2 bias
    ]).astype(jnp.float32)                                      # (9, M)

    # SubSpectralNorm scale/shift (freq depthwise bias folded into the shift).
    ssn_s = params["ssn_s"]                                     # (F, Cout)
    ssn_b = params["ssn_b"] + dwf_b[None, :] * ssn_s
    ssn = jnp.stack([jnp.tile(ssn_s, (1, T)),
                     jnp.tile(ssn_b, (1, T))]).astype(jnp.float32)   # (2, F, M)

    return w1_big, w2_big, vec, ssn


def _default_batch_block(n, bytes_per_sample):
    """Pick a batch block that gives >= 2 grid steps when possible (pipeline
    overlap + both v7x TensorCores via the "parallel" axis) while keeping
    per-step HBM traffic comfortably above the ~0.35 us per-step overhead."""
    if n <= 1:
        return max(n, 1)
    bb = max(1, min(n // 2, (512 * 1024) // max(bytes_per_sample, 1)))
    while n % bb:
        bb -= 1
    return bb


def transition_block_nhwc(x_nhwc, params, *, dilation=1, batch_block=None):
    """TransitionBlock forward on an NHWC = (N, F, T, Cin) input.

    Preferred entry point: keeping the surrounding model NHWC avoids the two
    full-tensor HBM transposes of the NCHW wrapper.  Activations are bf16 at
    the HBM boundary (f32 math inside the kernel); the result is bfloat16."""
    N, F, T, Cin = x_nhwc.shape
    Cout = params["w1"].shape[1]
    M = T * Cout
    dC = dilation * Cout
    lane_pad = 128 * ((dC + 127) // 128)        # aligned pad for the time conv
    if batch_block is None:
        batch_block = _default_batch_block(N, 2 * F * (T * Cin + M))
    if N % batch_block:
        raise ValueError("batch size must be divisible by batch_block")

    w1_big, w2_big, vec, ssn = _pack_params(params, T)
    # Merged (time, channel) lane axis; bf16 at the HBM boundary.
    x_m = x_nhwc.reshape(N, F, T * Cin).astype(jnp.bfloat16)

    kernel = functools.partial(_transition_kernel, cout=Cout, dilation=dilation)
    out = pl.pallas_call(
        kernel,
        grid=(N // batch_block,),
        in_specs=[
            pl.BlockSpec((batch_block, F, T * Cin), lambda n: (n, 0, 0)),
            # Constant-index weight blocks; total < 0.5 MiB so the default
            # double-buffering is harmless on every generation.
            pl.BlockSpec(w1_big.shape, lambda n: (0, 0)),
            pl.BlockSpec(w2_big.shape, lambda n: (0, 0)),
            pl.BlockSpec(vec.shape, lambda n: (0, 0)),
            pl.BlockSpec(ssn.shape, lambda n: (0, 0, 0)),
        ],
        out_specs=pl.BlockSpec((batch_block, F, M), lambda n: (n, 0, 0)),
        out_shape=jax.ShapeDtypeStruct((N, F, M), jnp.bfloat16),
        scratch_shapes=[
            pltpu.VMEM((batch_block, F + 2, M), jnp.float32),          # freq pad
            pltpu.VMEM((batch_block, lane_pad + M + lane_pad),
                       jnp.float32),                                    # time pad
        ],
        compiler_params=pltpu.CompilerParams(
            dimension_semantics=("parallel",)),
    )(x_m, w1_big, w2_big, vec, ssn)
    return out.reshape(N, F, T, Cout)


def transition_block(x_nchw, params, *, dilation=1, batch_block=None):
    """NCHW-compatible wrapper (PyTorch layout).  The two transposes below are
    the only full-tensor HBM relayouts and roughly triple total HBM traffic;
    prefer transition_block_nhwc inside an NHWC model."""
    x = jnp.transpose(x_nchw, (0, 2, 3, 1))     # (N, F, T, Cin)
    out = transition_block_nhwc(x, params, dilation=dilation,
                                batch_block=batch_block)
    return jnp.transpose(out, (0, 3, 1, 2))     # back to NCHW


def make_params(key, in_chan, out_chan, n_freq, subbands=5, eps=1e-5):
    """Deterministic synthetic parameters; BatchNorms folded to scale/shift."""
    assert n_freq % subbands == 0, "SubSpectralNorm needs F divisible by bands"
    keys = jax.random.split(key, 20)

    def u(k, shape, scale=0.3):
        return jax.random.uniform(k, shape, jnp.float32, -scale, scale)

    def fold_bn(kg, kb, km, kv, n):
        g = 1.0 + u(kg, (n,), 0.1)
        b = u(kb, (n,), 0.1)
        m = u(km, (n,), 0.1)
        v = 1.0 + u(kv, (n,), 0.2)
        s = g / jnp.sqrt(v + eps)
        return s, b - m * s

    # f2: 1x1 conv  (PyTorch weight (out,in,1,1) -> (in,out))
    w1 = u(keys[0], (in_chan, out_chan))
    b1 = u(keys[1], (1, out_chan))
    bn1_s, bn1_sh = fold_bn(keys[2], keys[3], keys[4], keys[5], out_chan)
    # f2: depthwise (3,1) conv  (PyTorch weight (out,1,3,1) -> (3,out))
    dwf_w = u(keys[6], (3, out_chan))
    dwf_b = u(keys[7], (1, out_chan))
    # SubSpectralNorm: BatchNorm2d(out*S) folded, mapped to per-(freq, chan)
    ssn_s_cs, ssn_sh_cs = fold_bn(keys[8], keys[9], keys[10], keys[11],
                                  out_chan * subbands)
    ssn_s_cs = ssn_s_cs.reshape(out_chan, subbands)
    ssn_sh_cs = ssn_sh_cs.reshape(out_chan, subbands)
    sub_idx = jnp.arange(n_freq) // (n_freq // subbands)
    ssn_s = ssn_s_cs[:, sub_idx].T                 # (F, Cout)
    ssn_b = ssn_sh_cs[:, sub_idx].T                # (F, Cout)
    # f1: depthwise (1,3) conv  (PyTorch weight (out,1,1,3) -> (3,out))
    dwt_w = u(keys[12], (3, out_chan))
    dwt_b = u(keys[13], (1, out_chan))
    bn3_s, bn3_sh = fold_bn(keys[14], keys[15], keys[16], keys[17], out_chan)
    # f1: 1x1 conv
    w2 = u(keys[18], (out_chan, out_chan))
    b2 = u(keys[19], (1, out_chan))

    return dict(
        w1=w1, b1=b1,
        bn1_s=bn1_s.reshape(1, -1), bn1_b=bn1_sh.reshape(1, -1),
        dwf_w=dwf_w, dwf_b=dwf_b,
        ssn_s=ssn_s, ssn_b=ssn_b,
        dwt_w=dwt_w, dwt_b=dwt_b,
        bn3_s=bn3_s.reshape(1, -1), bn3_b=bn3_sh.reshape(1, -1),
        w2=w2, b2=b2)


def reference(x_nchw, P, dilation=1):
    """Pure-JAX f32 reference (same eval-mode semantics) for the check."""
    x = jnp.transpose(x_nchw, (0, 2, 3, 1)).astype(jnp.float32)  # (N,F,T,Cin)
    y = jnp.einsum("nftc,cd->nftd", x, P["w1"]) + P["b1"][0]
    y = jax.nn.relu(y * P["bn1_s"][0] + P["bn1_b"][0])
    yp = jnp.pad(y, ((0, 0), (1, 1), (0, 0), (0, 0)))
    y = (P["dwf_w"][0] * yp[:, :-2] + P["dwf_w"][1] * yp[:, 1:-1]
         + P["dwf_w"][2] * yp[:, 2:]) + P["dwf_b"][0]
    y = y * P["ssn_s"][None, :, None, :] + P["ssn_b"][None, :, None, :]
    z = jnp.mean(y, axis=1, keepdims=True)
    d = dilation
    zp = jnp.pad(z, ((0, 0), (0, 0), (d, d), (0, 0)))
    z = (P["dwt_w"][0] * zp[:, :, :-2 * d] + P["dwt_w"][1] * zp[:, :, d:-d]
         + P["dwt_w"][2] * zp[:, :, 2 * d:]) + P["dwt_b"][0]
    z = z * P["bn3_s"][0] + P["bn3_b"][0]
    z = z * jax.nn.sigmoid(z)
    z = jnp.einsum("nutc,cd->nutd", z, P["w2"]) + P["b2"][0]
    out = jax.nn.relu(y + z)
    return jnp.transpose(out, (0, 3, 1, 2))


if __name__ == "__main__":
    key = jax.random.PRNGKey(0)
    kx, kp = jax.random.split(key)

    # F divisible by 5 (SubSpectralNorm); T*Cin = 128 and T*Cout = 256 make the
    # merged lane axis a multiple of 128 (dense loads / unmasked stores).
    N, Cin, Cout, F, T = 2, 8, 16, 20, 16
    x = jax.random.normal(kx, (N, Cin, F, T), jnp.float32)
    params = make_params(kp, Cin, Cout, F)

    out = transition_block(x, params, dilation=1)   # default: grid=(2,), bb=1
    out = jax.block_until_ready(out)
    assert out.shape == (N, Cout, F, T)

    # The kernel keeps activations bf16 at the HBM boundary (perf review), so
    # the f32 reference is evaluated at the same input quantization; remaining
    # drift is the bf16 MXU weight operands (f32 accumulation) and the final
    # bf16 store.  A structural error would be O(1), far above this tolerance.
    x_q = x.astype(jnp.bfloat16).astype(jnp.float32)
    ref = reference(x_q, params, dilation=1)
    assert jnp.allclose(out.astype(jnp.float32), ref, rtol=2e-2, atol=2e-2), \
        "mismatch vs reference"

    print("KERNEL_OK")
</pallas_src>

<mosaic_0001>
module attributes {stable_mosaic.version = 11 : i64} {
  func.func @_transition_kernel(%arg0: i32, %arg1: memref<1x20x128xbf16, #tpu.memory_space<vmem>>, %arg2: memref<128x256xbf16, #tpu.memory_space<vmem>>, %arg3: memref<256x256xbf16, #tpu.memory_space<vmem>>, %arg4: memref<9x256xf32, #tpu.memory_space<vmem>>, %arg5: memref<2x20x256xf32, #tpu.memory_space<vmem>>, %arg6: memref<1x20x256xbf16, #tpu.memory_space<vmem>>, %arg7: memref<1x22x256xf32, #tpu.memory_space<vmem>>, %arg8: memref<1x512xf32, #tpu.memory_space<vmem>>) attributes {dimension_semantics = [#tpu.dimension_semantics<parallel>], iteration_bounds = array<i64: 2>, scalar_prefetch = 0 : i64, scratch_operands = 2 : i64, tpu.core_type = #tpu.core_type<tc>, window_params = [{transform_indices = @transform_0, window_bounds = array<i64: 1, 20, 128>}, {pipeline_mode = #tpu.pipeline_mode<synchronous>, transform_indices = @transform_1, window_bounds = array<i64: 128, 256>}, {pipeline_mode = #tpu.pipeline_mode<synchronous>, transform_indices = @transform_2, window_bounds = array<i64: 256, 256>}, {pipeline_mode = #tpu.pipeline_mode<synchronous>, transform_indices = @transform_3, window_bounds = array<i64: 9, 256>}, {pipeline_mode = #tpu.pipeline_mode<synchronous>, transform_indices = @transform_4, window_bounds = array<i64: 2, 20, 256>}, {transform_indices = @transform_5, window_bounds = array<i64: 1, 20, 256>}]} {
    %c0 = arith.constant 0 : index
    %c0_0 = arith.constant 0 : index
    %0 = vector.load %arg4[%c0, %c0_0] : memref<9x256xf32, #tpu.memory_space<vmem>>, vector<9x256xf32>
    %c0_1 = arith.constant 0 : index
    %c0_2 = arith.constant 0 : index
    %c0_3 = arith.constant 0 : index
    %1 = vector.load %arg1[%c0_1, %c0_2, %c0_3] : memref<1x20x128xbf16, #tpu.memory_space<vmem>>, vector<1x20x128xbf16>
    %2 = vector.shape_cast %1 : vector<1x20x128xbf16> to vector<20x128xbf16>
    %c0_4 = arith.constant 0 : index
    %c0_5 = arith.constant 0 : index
    %3 = vector.load %arg2[%c0_4, %c0_5] : memref<128x256xbf16, #tpu.memory_space<vmem>>, vector<128x256xbf16>
    %cst = arith.constant dense<0.000000e+00> : vector<20x256xf32>
    %4 = tpu.matmul %2, %3, %cst {dimension_numbers = #tpu.dot_dimension_numbers<[1], [0], [0], [1], [0, 0, 1, 1], [], []>} : vector<20x128xbf16>, vector<128x256xbf16>, vector<20x256xf32> -> vector<20x256xf32>
    %5 = vector.shape_cast %4 : vector<20x256xf32> to vector<1x20x256xf32>
    %6 = vector.extract_strided_slice %0 {offsets = [0, 0], sizes = [1, 256], strides = [1, 1]} : vector<9x256xf32> to vector<1x256xf32>
    %7 = vector.shape_cast %6 : vector<1x256xf32> to vector<256xf32>
    %8 = vector.shape_cast %7 : vector<256xf32> to vector<1x1x256xf32>
    %9 = vector.broadcast %8 : vector<1x1x256xf32> to vector<1x20x256xf32>
    %10 = arith.addf %5, %9 : vector<1x20x256xf32>
    %cst_6 = arith.constant 0.000000e+00 : f32
    %11 = vector.broadcast %cst_6 : f32 to vector<1x20x256xf32>
    %12 = arith.maximumf %10, %11 : vector<1x20x256xf32>
    %cst_7 = arith.constant 0.000000e+00 : f32
    %13 = vector.broadcast %cst_7 : f32 to vector<1x1x256xf32>
    %c0_8 = arith.constant 0 : index
    %c0_9 = arith.constant 0 : index
    %c0_10 = arith.constant 0 : index
    %14 = vector.load %arg7[%c0_8, %c0_9, %c0_10] : memref<1x22x256xf32, #tpu.memory_space<vmem>>, vector<1x1x256xf32>
    tpu.vector_store %arg7[%c0_8, %c0_9, %c0_10], %13 {strides = array<i32>} : memref<1x22x256xf32, #tpu.memory_space<vmem>>, vector<1x1x256xf32>,
    %cst_11 = arith.constant 0.000000e+00 : f32
    %15 = vector.broadcast %cst_11 : f32 to vector<1x1x256xf32>
    %c0_12 = arith.constant 0 : index
    %c21 = arith.constant 21 : index
    %c0_13 = arith.constant 0 : index
    %16 = vector.load %arg7[%c0_12, %c21, %c0_13] : memref<1x22x256xf32, #tpu.memory_space<vmem>>, vector<1x1x256xf32>
    tpu.vector_store %arg7[%c0_12, %c21, %c0_13], %15 {strides = array<i32>} : memref<1x22x256xf32, #tpu.memory_space<vmem>>, vector<1x1x256xf32>,
    %c0_14 = arith.constant 0 : index
    %c1 = arith.constant 1 : index
    %c0_15 = arith.constant 0 : index
    %17 = vector.load %arg7[%c0_14, %c1, %c0_15] : memref<1x22x256xf32, #tpu.memory_space<vmem>>, vector<1x20x256xf32>
    tpu.vector_store %arg7[%c0_14, %c1, %c0_15], %12 {strides = array<i32>} : memref<1x22x256xf32, #tpu.memory_space<vmem>>, vector<1x20x256xf32>,
    %18 = vector.extract_strided_slice %0 {offsets = [1, 0], sizes = [1, 256], strides = [1, 1]} : vector<9x256xf32> to vector<1x256xf32>
    %19 = vector.shape_cast %18 : vector<1x256xf32> to vector<256xf32>
    %c0_16 = arith.constant 0 : index
    %c0_17 = arith.constant 0 : index
    %c0_18 = arith.constant 0 : index
    %20 = vector.load %arg7[%c0_16, %c0_17, %c0_18] : memref<1x22x256xf32, #tpu.memory_space<vmem>>, vector<1x20x256xf32>
    %21 = vector.shape_cast %19 : vector<256xf32> to vector<1x1x256xf32>
    %22 = vector.broadcast %21 : vector<1x1x256xf32> to vector<1x20x256xf32>
    %23 = arith.mulf %22, %20 : vector<1x20x256xf32>
    %24 = vector.extract_strided_slice %0 {offsets = [2, 0], sizes = [1, 256], strides = [1, 1]} : vector<9x256xf32> to vector<1x256xf32>
    %25 = vector.shape_cast %24 : vector<1x256xf32> to vector<256xf32>
    %c0_19 = arith.constant 0 : index
    %c1_20 = arith.constant 1 : index
    %c0_21 = arith.constant 0 : index
    %26 = vector.load %arg7[%c0_19, %c1_20, %c0_21] : memref<1x22x256xf32, #tpu.memory_space<vmem>>, vector<1x20x256xf32>
    %27 = vector.shape_cast %25 : vector<256xf32> to vector<1x1x256xf32>
    %28 = vector.broadcast %27 : vector<1x1x256xf32> to vector<1x20x256xf32>
    %29 = arith.mulf %28, %26 : vector<1x20x256xf32>
    %30 = arith.addf %23, %29 : vector<1x20x256xf32>
    %31 = vector.extract_strided_slice %0 {offsets = [3, 0], sizes = [1, 256], strides = [1, 1]} : vector<9x256xf32> to vector<1x256xf32>
    %32 = vector.shape_cast %31 : vector<1x256xf32> to vector<256xf32>
    %c0_22 = arith.constant 0 : index
    %c2 = arith.constant 2 : index
    %c0_23 = arith.constant 0 : index
    %33 = vector.load %arg7[%c0_22, %c2, %c0_23] : memref<1x22x256xf32, #tpu.memory_space<vmem>>, vector<1x20x256xf32>
    %34 = vector.shape_cast %32 : vector<256xf32> to vector<1x1x256xf32>
    %35 = vector.broadcast %34 : vector<1x1x256xf32> to vector<1x20x256xf32>
    %36 = arith.mulf %35, %33 : vector<1x20x256xf32>
    %37 = arith.addf %30, %36 : vector<1x20x256xf32>
    %c0_24 = arith.constant 0 : index
    %c0_25 = arith.constant 0 : index
    %c0_26 = arith.constant 0 : index
    %38 = vector.load %arg5[%c0_24, %c0_25, %c0_26] : memref<2x20x256xf32, #tpu.memory_space<vmem>>, vector<2x20x256xf32>
    %39 = vector.extract_strided_slice %38 {offsets = [0, 0, 0], sizes = [1, 20, 256], strides = [1, 1, 1]} : vector<2x20x256xf32> to vector<1x20x256xf32>
    %40 = vector.shape_cast %39 : vector<1x20x256xf32> to vector<20x256xf32>
    %41 = vector.shape_cast %40 : vector<20x256xf32> to vector<1x20x256xf32>
    %42 = arith.mulf %37, %41 : vector<1x20x256xf32>
    %43 = vector.extract_strided_slice %38 {offsets = [1, 0, 0], sizes = [1, 20, 256], strides = [1, 1, 1]} : vector<2x20x256xf32> to vector<1x20x256xf32>
    %44 = vector.shape_cast %43 : vector<1x20x256xf32> to vector<20x256xf32>
    %45 = vector.shape_cast %44 : vector<20x256xf32> to vector<1x20x256xf32>
    %46 = arith.addf %42, %45 : vector<1x20x256xf32>
    %cst_27 = arith.constant dense<0.000000e+00> : vector<1x256xf32>
    %47 = vector.multi_reduction <add>, %46, %cst_27 [1] : vector<1x20x256xf32> to vector<1x256xf32>
    %cst_28 = arith.constant 2.000000e+01 : f32
    %48 = vector.broadcast %cst_28 : f32 to vector<1x256xf32>
    %49 = arith.divf %47, %48 : vector<1x256xf32>
    %cst_29 = arith.constant 0.000000e+00 : f32
    %50 = vector.broadcast %cst_29 : f32 to vector<1x512xf32>
    %c0_30 = arith.constant 0 : index
    %c0_31 = arith.constant 0 : index
    %51 = vector.load %arg8[%c0_30, %c0_31] : memref<1x512xf32, #tpu.memory_space<vmem>>, vector<1x512xf32>
    tpu.vector_store %arg8[%c0_30, %c0_31], %50 {strides = array<i32>} : memref<1x512xf32, #tpu.memory_space<vmem>>, vector<1x512xf32>,
    %c0_32 = arith.constant 0 : index
    %c128 = arith.constant 128 : index
    %52 = vector.load %arg8[%c0_32, %c128] : memref<1x512xf32, #tpu.memory_space<vmem>>, vector<1x256xf32>
    tpu.vector_store %arg8[%c0_32, %c128], %49 {strides = array<i32>} : memref<1x512xf32, #tpu.memory_space<vmem>>, vector<1x256xf32>,
    %53 = vector.extract_strided_slice %0 {offsets = [4, 0], sizes = [1, 256], strides = [1, 1]} : vector<9x256xf32> to vector<1x256xf32>
    %54 = vector.shape_cast %53 : vector<1x256xf32> to vector<256xf32>
    %c0_33 = arith.constant 0 : index
    %c112 = arith.constant 112 : index
    %55 = vector.load %arg8[%c0_33, %c112] : memref<1x512xf32, #tpu.memory_space<vmem>>, vector<1x256xf32>
    %56 = vector.shape_cast %54 : vector<256xf32> to vector<1x256xf32>
    %57 = arith.mulf %56, %55 : vector<1x256xf32>
    %58 = vector.extract_strided_slice %0 {offsets = [5, 0], sizes = [1, 256], strides = [1, 1]} : vector<9x256xf32> to vector<1x256xf32>
    %59 = vector.shape_cast %58 : vector<1x256xf32> to vector<256xf32>
    %60 = vector.shape_cast %59 : vector<256xf32> to vector<1x256xf32>
    %61 = arith.mulf %60, %49 : vector<1x256xf32>
    %62 = arith.addf %57, %61 : vector<1x256xf32>
    %63 = vector.extract_strided_slice %0 {offsets = [6, 0], sizes = [1, 256], strides = [1, 1]} : vector<9x256xf32> to vector<1x256xf32>
    %64 = vector.shape_cast %63 : vector<1x256xf32> to vector<256xf32>
    %c0_34 = arith.constant 0 : index
    %c144 = arith.constant 144 : index
    %65 = vector.load %arg8[%c0_34, %c144] : memref<1x512xf32, #tpu.memory_space<vmem>>, vector<1x256xf32>
    %66 = vector.shape_cast %64 : vector<256xf32> to vector<1x256xf32>
    %67 = arith.mulf %66, %65 : vector<1x256xf32>
    %68 = arith.addf %62, %67 : vector<1x256xf32>
    %69 = vector.extract_strided_slice %0 {offsets = [7, 0], sizes = [1, 256], strides = [1, 1]} : vector<9x256xf32> to vector<1x256xf32>
    %70 = vector.shape_cast %69 : vector<1x256xf32> to vector<256xf32>
    %71 = vector.shape_cast %70 : vector<256xf32> to vector<1x256xf32>
    %72 = arith.addf %68, %71 : vector<1x256xf32>
    %73 = arith.negf %72 : vector<1x256xf32>
    %74 = math.exp %73 : vector<1x256xf32>
    %cst_35 = arith.constant 1.000000e+00 : f32
    %75 = vector.broadcast %cst_35 : f32 to vector<1x256xf32>
    %76 = arith.addf %75, %74 : vector<1x256xf32>
    %77 = arith.divf %75, %76 : vector<1x256xf32>
    %78 = arith.mulf %72, %77 : vector<1x256xf32>
    %79 = arith.truncf %78 : vector<1x256xf32> to vector<1x256xbf16>
    %c0_36 = arith.constant 0 : index
    %c0_37 = arith.constant 0 : index
    %80 = vector.load %arg3[%c0_36, %c0_37] : memref<256x256xbf16, #tpu.memory_space<vmem>>, vector<256x256xbf16>
    %cst_38 = arith.constant dense<0.000000e+00> : vector<1x256xf32>
    %81 = tpu.matmul %79, %80, %cst_38 {dimension_numbers = #tpu.dot_dimension_numbers<[1], [0], [0], [1], [0, 0, 1, 1], [], []>} : vector<1x256xbf16>, vector<256x256xbf16>, vector<1x256xf32> -> vector<1x256xf32>
    %82 = vector.extract_strided_slice %0 {offsets = [8, 0], sizes = [1, 256], strides = [1, 1]} : vector<9x256xf32> to vector<1x256xf32>
    %83 = vector.shape_cast %82 : vector<1x256xf32> to vector<256xf32>
    %84 = vector.shape_cast %83 : vector<256xf32> to vector<1x256xf32>
    %85 = arith.addf %81, %84 : vector<1x256xf32>
    %86 = vector.shape_cast %85 : vector<1x256xf32> to vector<1x1x256xf32>
    %87 = vector.broadcast %86 : vector<1x1x256xf32> to vector<1x20x256xf32>
    %88 = arith.addf %46, %87 : vector<1x20x256xf32>
    %cst_39 = arith.constant 0.000000e+00 : f32
    %89 = vector.broadcast %cst_39 : f32 to vector<1x20x256xf32>
    %90 = arith.maximumf %88, %89 : vector<1x20x256xf32>
    %91 = arith.truncf %90 : vector<1x20x256xf32> to vector<1x20x256xbf16>
    %c0_40 = arith.constant 0 : index
    %c0_41 = arith.constant 0 : index
    %c0_42 = arith.constant 0 : index
    %92 = vector.load %arg6[%c0_40, %c0_41, %c0_42] : memref<1x20x256xbf16, #tpu.memory_space<vmem>>, vector<1x20x256xbf16>
    tpu.vector_store %arg6[%c0_40, %c0_41, %c0_42], %91 {strides = array<i32>} : memref<1x20x256xbf16, #tpu.memory_space<vmem>>, vector<1x20x256xbf16>,
    return
  }
  func.func @transform_0(%arg0: i32) -> (i32, i32, i32) {
    %c0_i32 = arith.constant 0 : i32
    %c0_i32_0 = arith.constant 0 : i32
    %c0_i32_1 = arith.constant 0 : i32
    return %arg0, %c0_i32, %c0_i32_0 : i32, i32, i32
  }
  func.func @transform_1(%arg0: i32) -> (i32, i32) {
    %c0_i32 = arith.constant 0 : i32
    %c0_i32_0 = arith.constant 0 : i32
    %c0_i32_1 = arith.constant 0 : i32
    return %c0_i32, %c0_i32_0 : i32, i32
  }
  func.func @transform_2(%arg0: i32) -> (i32, i32) {
    %c0_i32 = arith.constant 0 : i32
    %c0_i32_0 = arith.constant 0 : i32
    %c0_i32_1 = arith.constant 0 : i32
    return %c0_i32, %c0_i32_0 : i32, i32
  }
  func.func @transform_3(%arg0: i32) -> (i32, i32) {
    %c0_i32 = arith.constant 0 : i32
    %c0_i32_0 = arith.constant 0 : i32
    %c0_i32_1 = arith.constant 0 : i32
    return %c0_i32, %c0_i32_0 : i32, i32
  }
  func.func @transform_4(%arg0: i32) -> (i32, i32, i32) {
    %c0_i32 = arith.constant 0 : i32
    %c0_i32_0 = arith.constant 0 : i32
    %c0_i32_1 = arith.constant 0 : i32
    %c0_i32_2 = arith.constant 0 : i32
    return %c0_i32, %c0_i32_0, %c0_i32_1 : i32, i32, i32
  }
  func.func @transform_5(%arg0: i32) -> (i32, i32, i32) {
    %c0_i32 = arith.constant 0 : i32
    %c0_i32_0 = arith.constant 0 : i32
    %c0_i32_1 = arith.constant 0 : i32
    return %arg0, %c0_i32, %c0_i32_0 : i32, i32, i32
  }
}

</mosaic_0001>

<bundles_post_ra>
// kernel: tpu_custom_call.1
= control target key start
LH: loop header
LB: loop body
LE: loop exit
PB: predicated region body
PF: predicated region fallthrough
CT: control target
= control target key end

     0   :  { %10 = vsyncpa [#allocation5], 0  ;;  %s1415_s18 = smov 0   ;;  %s1678_s0 = inlined_call_operand.vmem [shape: bf16[2,20,128], index: 0, kind: input, shape index: {}]   ;;  %s1679_s1 = inlined_call_operand.vmem [shape: bf16[128,256], index: 1, kind: input, shape index: {}]   ;;  %s1680_s2 = inlined_call_operand.hbm [shape: bf16[256,256], index: 2, kind: input, shape index: {}]   ;;  %s1681_s3 = inlined_call_operand.vmem [shape: f32[9,256], index: 3, kind: input, shape index: {}]   ;;  %s1682_s4 = inlined_call_operand.vmem [shape: f32[2,20,256], index: 4, kind: input, shape index: {}]   ;;  %s1683_s5 = inlined_call_operand.vmem [shape: bf16[2,20,256], index: 5, kind: output, shape index: {}]  }
   0x1 LB: > { %s171_s21 = sshll.u32 %s1680_s2, 4  ;;  %s1424_s22 = sadd.s32 4294967295, %s1376_s18   ;;  %s1376_s18 = sphi %s1415_s18, %s16_s18   ;;  %s172_s21 = int_to_ptr.hbm [resolvable:$true] %s171_s21 }
   0x2   : > { %p1043_p0 = scmp.ge.s32.totalorder %s1376_s18, 1  ;;  %p157_p1 = scmp.lt.s32.totalorder %s1376_s18, 3 }
   0x3   : > { %p1309_p2 = scmp.eq.s32.totalorder %s1424_s22, 0  ;;  %s1378_s23 = smov [#allocation4]  }
   0x4   : > { %p158_p3 = pnand %p1043_p0, %p157_p1  ;;  %s173_s24 = sshll.u32 %s1378_s23, 4  ;;  %s174_s24 = int_to_ptr.vmem [resolvable:$true] %s173_s24 }
   0x5   : > { %s1379_s25 = smov 128   ;;  %s1380_s26 = smov 8  }
   0x6   : > { %p1305_p4 = pneg %p158_p3  ;;  %203 = sbr.rel (%p158_p3) target bundleno = 563 (0x233), region = 40 }
   0x8   : > { %p1306_p5 = pnand %p1309_p2, %p1305_p4 }
   0xa   : > { %1308 = dma.hbm_to_vmem [thread:$0]  (!%p1306_p5), %s172_s21, 4096, %s174_s24, [#allocation5], %s1379_s25, %s1379_s25, %s1380_s26  }
   0xb   : > { %1371 = dma.done.wait (%p1309_p2), [#allocation5], 4096  }
   0xc   : > { %1373 = vsyncadd (%p1309_p2), [#allocation5], 4294963200  ;;  %v1112_v0 = vld [vmem:[%s1679_s1 + $0x70] sm:$0xf]  ;;  %v1266_v1 = vld [vmem:[%s1679_s1 + $0x74] sm:$0xf0]  ;;  %v405_v52 = vlaneseq }
   0xd   : > { %v1265_v2 = vld [vmem:[%s1679_s1 + $0x74] sm:$0xf]  ;;  %v1113_v3 = vor.u32 %v1266_v1, %v1112_v0  ;;  %v1114_v4 = vld [vmem:[%s1679_s1 + $0x78] sm:$0xf0]  ;;  %v1104_v5 = vld [vmem:[%s1679_s1 + $0x60] sm:$0xf] }
   0xe   : > { %v1264_v6 = vld [vmem:[%s1679_s1 + $0x64] sm:$0xf0]  ;;  %v1117_v7 = vor.u32 %v1265_v2, %v1114_v4  ;;  %v1263_v8 = vld [vmem:[%s1679_s1 + $0x64] sm:$0xf]  ;;  %v1106_v9 = vld [vmem:[%s1679_s1 + $0x68] sm:$0xf0] }
   0xf   : > { %355 = vmatpush.bf16.msra.mxu0 %v1113_v3  ;;  %v1105_v10 = vor.u32 %v1264_v6, %v1104_v5  ;;  %v1109_v11 = vor.u32 %v1263_v8, %v1106_v9  ;;  %v1096_v12 = vld [vmem:[%s1679_s1 + $0x50] sm:$0xf]  ;;  %v1262_v13 = vld [vmem:[%s1679_s1 + $0x54] sm:$0xf0]  ;;  %v1261_v14 = vld [vmem:[%s1679_s1 + $0x54] sm:$0xf] }
  0x10   : > { %373 = vmatpush.bf16.msra.mxu1 %v1117_v7  ;;  %v1098_v15 = vld [vmem:[%s1679_s1 + $0x58] sm:$0xf0]  ;;  %v1097_v16 = vor.u32 %v1262_v13, %v1096_v12  ;;  %v1088_v18 = vld [vmem:[%s1679_s1 + $0x40] sm:$0xf]  ;;  %v1260_v19 = vld [vmem:[%s1679_s1 + $0x44] sm:$0xf0] }
  0x11   : > { %v1101_v17 = vor.u32 %v1261_v14, %v1098_v15  ;;  %v1259_v20 = vld [vmem:[%s1679_s1 + $0x44] sm:$0xf]  ;;  %v1090_v21 = vld [vmem:[%s1679_s1 + $0x48] sm:$0xf0]  ;;  %v1089_v22 = vor.u32 %v1260_v19, %v1088_v18  ;;  %v1080_v24 = vld [vmem:[%s1679_s1 + $0x30] sm:$0xf] }
  0x12   : > { %v1093_v23 = vor.u32 %v1259_v20, %v1090_v21  ;;  %v1258_v25 = vld [vmem:[%s1679_s1 + $0x34] sm:$0xf0]  ;;  %v1257_v26 = vld [vmem:[%s1679_s1 + $0x34] sm:$0xf]  ;;  %v1082_v27 = vld [vmem:[%s1679_s1 + $0x38] sm:$0xf0] }
  0x13   : > { %356 = vmatpush.bf16.msra.mxu0 %v1105_v10  ;;  %v1081_v28 = vor.u32 %v1258_v25, %v1080_v24  ;;  %p232_p6 = scmp.lt.s32.totalorder %s1424_s22, 1  ;;  %v1085_v29 = vor.u32 %v1257_v26, %v1082_v27  ;;  %v1072_v30 = vld [vmem:[%s1679_s1 + $0x20] sm:$0xf]  ;;  %v1256_v31 = vld [vmem:[%s1679_s1 + $0x24] sm:$0xf0]  ;;  %vm1534_vm0 = vcmp.lt.s32.totalorder %v405_v52, 256 }
  0x14   : > { %374 = vmatpush.bf16.msra.mxu1 %v1109_v11  ;;  %v1255_v32 = vld [vmem:[%s1679_s1 + $0x24] sm:$0xf]  ;;  %v1074_v33 = vld [vmem:[%s1679_s1 + $0x28] sm:$0xf0]  ;;  %v1073_v34 = vor.u32 %v1256_v31, %v1072_v30  ;;  %v1064_v36 = vld [vmem:[%s1679_s1 + $0x10] sm:$0xf] }
  0x15   : > { %s1687_s22 = smov (!%p232_p6, %s1424_s22), 1  ;;  %v1077_v35 = vor.u32 %v1255_v32, %v1074_v33  ;;  %v1254_v37 = vld [vmem:[%s1679_s1 + $0x14] sm:$0xf0]  ;;  %v1253_v38 = vld [vmem:[%s1679_s1 + $0x14] sm:$0xf]  ;;  %v1381_v54 = vmov 0.0  }
  0x16   : > { %v1066_v39 = vld [vmem:[%s1679_s1 + $0x18] sm:$0xf0]  ;;  %v1065_v40 = vor.u32 %v1254_v37, %v1064_v36  ;;  %s1299_s12 = smul.u32 12, %s1687_s22  ;;  %v1056_v42 = vld [vmem:[%s1679_s1] sm:$0xf]  ;;  %v1552_v56 = vld [vmem:[%s1681_s3 + $0x8] sm:$0xff] }
  0x17   : > { %357 = vmatpush.bf16.msra.mxu0 %v1097_v16  ;;  %v1069_v41 = vor.u32 %v1253_v38, %v1066_v39  ;;  %v1252_v43 = vld [vmem:[%s1679_s1 + $0x4] sm:$0xf0]  ;;  %v1251_v44 = vld [vmem:[%s1679_s1 + $0x4] sm:$0xf]  ;;  %v1058_v45 = vld [vmem:[%s1679_s1 + $0x8] sm:$0xf0] }
  0x18   : > { %375 = vmatpush.bf16.msra.mxu1 %v1101_v17  ;;  %v1057_v46 = vor.u32 %v1252_v43, %v1056_v42  ;;  %s236_s25 = scalar_lea.vmem %s1678_s0, %s1299_s12  ;;  %v1061_v47 = vor.u32 %v1251_v44, %v1058_v45  ;;  %409 = vst.msk [vmem:[#allocation2] ss:$8 sm:$0x3] %vm1534_vm0, %v1381_v54  ;;  %v1547_v55 = vld [vmem:[%s1681_s3] sm:$0xff]  ;;  %v392_v58 = vperm.slane %v1552_v56, 0  ;;  %vm420_vm1 = vcmask 1040384  }
  0x19   : > { %v1250_v48 = vld [vmem:[%s236_s25] sm:$0xff]  ;;  %v248_v49 = vld [vmem:[%s236_s25 + $0x8] sm:$0x3]  ;;  %412 = vst.msk [vmem:[#allocation2 + $0x25] ss:$8 sm:$0x3] %vm1534_vm0, %v1381_v54 }
  0x1a   : > { %v270_v50 = vunpack.c.l.b16 %v248_v49  ;;  %v391_v57 = vperm.slane %v1547_v55, 0  ;;  %v461_v13 = vperm.slane %v1547_v55, 2  ;;  %v462_v18 = vperm.slane %v1552_v56, 2  ;;  %s1383_s6 = smov 112   ;;  %s1384_s7 = smov 16  }
  0x1b   : > { %358 = vmatpush.bf16.msra.mxu0 %v1089_v22  ;;  %v502_v24 = vperm.slane %v1547_v55, 3  ;;  %v503_v33 = vperm.slane %v1552_v56, 3  ;;  %v449_v37 = vperm.slane %v1547_v55, 1  ;;  %vm475_vm2 = vcmask 1046528   ;;  %v1242_v53 = vld [vmem:[#allocation4 + $0xf0] sm:$0xf] }
  0x1c   : > { %376 = vmatpush.bf16.msra.mxu1 %v1093_v23  ;;  %v272_v51 = vpack.c.b16 %v270_v50, %v270_v50  ;;  %v450_v45 = vperm.slane %v1552_v56, 1  ;;  %vm516_vm3 = vcmask 1045504   ;;  %vm591_vm4 = vcmp.lt.s32.totalorder %v405_v52, 512  ;;  %s1300_s12 = smul.u32 24, %s1687_s22 }
  0x1d   : > { %593 = vst.msk [vmem:[#allocation3] sm:$0xf] %vm591_vm4, %v1381_v54  ;;  %vm564_vm5 = vcmask 1043456   ;;  %vm639_vm7 = vcmask 916480   ;;  %vm611_vm8 = vcmask 130048  }
  0x1e   : > { %s241_s15 = scalar_lea.vmem %s1683_s5, %s1300_s12 }
  0x1f   : > { %359 = vmatpush.bf16.msra.mxu0 %v1081_v28 }
  0x20   : > { %377 = vmatpush.bf16.msra.mxu1 %v1085_v29 }
  0x23   : > { %360 = vmatpush.bf16.msra.mxu0 %v1073_v34 }
  0x24   : > { %378 = vmatpush.bf16.msra.mxu1 %v1077_v35 }
  0x27   : > { %361 = vmatpush.bf16.msra.mxu0 %v1065_v40 }
  0x28   : > { %379 = vmatpush.bf16.msra.mxu1 %v1069_v41 }
  0x2b   : > { %362 = vmatpush.bf16.msra.mxu0 %v1057_v46 }
  0x2c   : > { %380 = vmatpush.bf16.msra.mxu1 %v1061_v47 }
  0x2e   : > { %363 = vmatmul.bf16.vlgmr.msra.gmra.mxu0 %v1250_v48 }
  0x2f   : > { %381 = vmatmul.bf16.vlgmr.msra.gmra.mxu1 %v1250_v48 }
  0x3e   : > { %368 = vmatmul.bf16.gmra.mxu0 %v272_v51 }
  0x3f   : > { %386 = vmatmul.bf16.gmra.mxu1 %v272_v51 }
  0xab   : > { %v364_v59 = vpop.f32.mrf.mxu0 }
  0xac   : > { %v393_v60 = vadd.f32 %v391_v57, %v364_v59  ;;  %v382_v61 = vpop.f32.mrf.mxu1 }
  0xad   : > { %v394_v62 = vadd.f32 %v392_v58, %v382_v61 }
  0xae   : > { %v399_v63 = vmax.f32 %v393_v60, 0.0 }
  0xaf   : > { %v400_v0 = vmax.f32 %v394_v62, 0.0 }
  0xb0   : > { %v421_v1 = vrot.slane %v399_v63, 7 }
  0xb1   : > { %v422_v2 = vrot.slane %v400_v0, 7 }
  0xb2   : > { %437 = vst [vmem:[#allocation2] sm:$0xfe] %v421_v1 }
  0xb3   : > { %438 = vst [vmem:[#allocation2 + $0x8] sm:$0xfe] %v422_v2  ;;  %v366_v3 = vpop.f32.mrf.mxu0 }
  0xb4   : > { %v395_v4 = vadd.f32 %v391_v57, %v366_v3  ;;  %v384_v5 = vpop.f32.mrf.mxu1 }
  0xb5   : > { %v396_v6 = vadd.f32 %v392_v58, %v384_v5 }
  0xb6   : > { %v401_v7 = vmax.f32 %v395_v4, 0.0 }
  0xb7   : > { %v402_v8 = vmax.f32 %v396_v6, 0.0 }
  0xb8   : > { %v423_v9 = vrot.slane %v401_v7, 7 }
  0xb9   : > { %v425_v10 = vrot.slane %v402_v8, 7  ;;  %v457_v15 = vld [vmem:[#allocation2] sm:$0xfe] }
  0xba   : > { %v1557_v11 = vsel %vm420_vm1, %v421_v1, %v423_v9  ;;  %v463_v21 = vmul.f32 %v461_v13, %v457_v15  ;;  %v458_v22 = vld [vmem:[#allocation2 + $0x8] sm:$0xfe]  ;;  %v498_v27 = vld [vmem:[#allocation2] sm:$0xfc] }
  0xbb   : > { %v369_v12 = vpop.f32.mrf.mxu0  ;;  %v426_v16 = vsel %vm420_vm1, %v422_v2, %v425_v10  ;;  %v465_v23 = vmul.f32 %v461_v13, %v1557_v11  ;;  %v464_v28 = vmul.f32 %v462_v18, %v458_v22  ;;  %v504_v38 = vmul.f32 %v502_v24, %v498_v27  ;;  %v499_v39 = vld [vmem:[#allocation2 + $0x8] sm:$0xfc]  ;;  %v443_v41 = vld [vmem:[#allocation2] sm:$0xff]  ;;  %v541_v27 = vld [vmem:[%s1682_s4 + $0x10] sm:$0xff] }
  0xbc   : > { %v387_v14 = vpop.f32.mrf.mxu1  ;;  %v397_v17 = vadd.f32 %v391_v57, %v369_v12  ;;  %v1564_v29 = vmul.f32 %v462_v18, %v426_v16  ;;  %v476_v32 = vrot.slane %v463_v21, 1  ;;  %v506_v40 = vmul.f32 %v502_v24, %v1557_v11  ;;  %v444_v50 = vld [vmem:[#allocation2 + $0x8] sm:$0xff] }
  0xbd   : > { %v398_v20 = vadd.f32 %v392_v58, %v387_v14  ;;  %v477_v34 = vrot.slane %v465_v23, 1  ;;  %v479_v43 = vrot.slane %v464_v28, 1  ;;  %v505_v46 = vmul.f32 %v503_v33, %v499_v39  ;;  %v544_v39 = vld [vmem:[%s1682_s4 + $0x28] sm:$0xf] }
  0xbe   : > { %v403_v19 = vmax.f32 %v397_v17, 0.0  ;;  %v480_v44 = vrot.slane %v1564_v29, 1  ;;  %v451_v48 = vmul.f32 %v449_v37, %v443_v41  ;;  %v517_v49 = vrot.slane %v504_v38, 2 }
  0xbf   : > { %v404_v26 = vmax.f32 %v398_v20, 0.0  ;;  %v478_v47 = vsel %vm475_vm2, %v476_v32, %v477_v34  ;;  %v518_v51 = vrot.slane %v506_v40, 2  ;;  %v507_v57 = vmul.f32 %v503_v33, %v426_v16  ;;  %v549_v32 = vld [vmem:[%s1682_s4 + $0x50] sm:$0xf] }
  0xc0   : > { %v427_v25 = vrot.slane %v403_v19, 7  ;;  %v492_v58 = vadd.f32 %v478_v47, %v451_v48  ;;  %v481_v59 = vsel %vm475_vm2, %v479_v43, %v480_v44  ;;  %v452_v63 = vmul.f32 %v450_v45, %v444_v50  ;;  %v542_v43 = vld [vmem:[%s1682_s4 + $0x18] sm:$0xff] }
  0xc1   : > { %v429_v35 = vrot.slane %v404_v26, 7  ;;  %v520_v0 = vrot.slane %v505_v46, 2  ;;  %v519_v3 = vsel %vm516_vm3, %v517_v49, %v518_v51  ;;  %v521_v4 = vrot.slane %v507_v57, 2  ;;  %v550_v48 = vld [vmem:[%s1682_s4 + $0x58] sm:$0xf]  ;;  %v548_v57 = vld [vmem:[%s1682_s4 + $0x48] sm:$0xff] }
  0xc2   : > { %v428_v30 = vsel %vm420_vm1, %v423_v9, %v427_v25  ;;  %v493_v5 = vadd.f32 %v481_v59, %v452_v63  ;;  %v453_v12 = vmul.f32 %v449_v37, %v1557_v11  ;;  %v533_v14 = vadd.f32 %v519_v3, %v492_v58  ;;  %v543_v11 = vld [vmem:[%s1682_s4 + $0x20] sm:$0xf]  ;;  %v546_v50 = vld [vmem:[%s1682_s4 + $0x38] sm:$0xff] }
  0xc3   : > { %v371_v31 = vpop.f32.mrf.mxu0  ;;  %441 = vst [vmem:[#allocation2 + $0x20] sm:$0x1f] %v428_v30  ;;  %v430_v42 = vsel %vm420_vm1, %v425_v10, %v429_v35  ;;  %v454_v15 = vmul.f32 %v450_v45, %v426_v16  ;;  %v1382_v22 = vmov 20.0   ;;  %v522_v23 = vsel %vm516_vm3, %v520_v0, %v521_v4  ;;  %v540_v30 = vld [vmem:[%s1682_s4 + $0x8] sm:$0xff]  ;;  %v545_v35 = vld [vmem:[%s1682_s4 + $0x30] sm:$0xff] }
  0xc4   : > { %v389_v36 = vpop.f32.mrf.mxu1  ;;  %442 = vst [vmem:[#allocation2 + $0x28] sm:$0x1f] %v430_v42  ;;  %1326 = vrcp.f32 %v1382_v22  ;;  %v534_v54 = vadd.f32 %v522_v23, %v493_v5 }
  0xc5   : > { %v547_v36 = vld [vmem:[%s1682_s4 + $0x40] sm:$0xff] }
  0xca   : > { %v447_v60 = vld [vmem:[#allocation2 + $0x20] sm:$0xf] }
  0xcb   : > { %v459_v61 = vld [vmem:[#allocation2 + $0x20] sm:$0x1f]  ;;  %v455_v6 = vmul.f32 %v449_v37, %v447_v60  ;;  %v448_v9 = vld [vmem:[#allocation2 + $0x28] sm:$0xf] }
  0xcc   : > { %v500_v62 = vld [vmem:[#allocation2 + $0x20] sm:$0x3f]  ;;  %v467_v1 = vmul.f32 %v461_v13, %v459_v61  ;;  %v460_v10 = vld [vmem:[#allocation2 + $0x28] sm:$0x1f]  ;;  %v456_v16 = vmul.f32 %v450_v45, %v448_v9  ;;  %v552_v45 = vmul.f32 %v540_v30, %v534_v54 }
  0xcd   : > { %v508_v2 = vmul.f32 %v502_v24, %v500_v62  ;;  %v468_v17 = vmul.f32 %v462_v18, %v460_v10  ;;  %v501_v19 = vld [vmem:[#allocation2 + $0x28] sm:$0x3f]  ;;  %v539_v13 = vld [vmem:[%s1682_s4] sm:$0xff] }
  0xce   : > { %v482_v7 = vrot.slane %v467_v1, 1  ;;  %v509_v21 = vmul.f32 %v503_v33, %v501_v19  ;;  %v551_v29 = vmul.f32 %v539_v13, %v533_v14  ;;  %v1630_v63 = vadd.f32 %v552_v45, %v546_v50  ;;  %v1234_v45 = vld [vmem:[#allocation4 + $0xe0] sm:$0xf] }
  0xcf   : > { %v523_v8 = vrot.slane %v508_v2, 2  ;;  %v484_v18 = vrot.slane %v468_v17, 1 }
  0xd0   : > { %v483_v52 = vsel %vm475_vm2, %v477_v34, %v482_v7  ;;  %v496_v20 = vadd.f32 %v482_v7, %v455_v6  ;;  %v525_v28 = vrot.slane %v509_v21, 2  ;;  %v1616_v49 = vadd.f32 %v551_v29, %v545_v35  ;;  %v1298_v35 = vld [vmem:[#allocation4 + $0xf4] sm:$0xf0] }
  0xd1   : > { %v494_v24 = vadd.f32 %v483_v52, %v453_v12  ;;  %v524_v25 = vsel %vm516_vm3, %v518_v51, %v523_v8  ;;  %v485_v33 = vsel %vm475_vm2, %v480_v44, %v484_v18  ;;  %v497_v34 = vadd.f32 %v484_v18, %v456_v16  ;;  %v1327_v44 = vpop.eup %1326 }
  0xd2   : > { %v537_v26 = vadd.f32 %v523_v8, %v496_v20  ;;  %v495_v38 = vadd.f32 %v485_v33, %v454_v15  ;;  %v526_v41 = vsel %vm516_vm3, %v521_v4, %v525_v28  ;;  %v583_v62 = vmul.f32 20.0, %v1327_v44  ;;  %v1282_v33 = vld [vmem:[#allocation4 + $0x74] sm:$0xf0] }
  0xd3   : > { %v535_v31 = vadd.f32 %v524_v25, %v494_v24  ;;  %v538_v42 = vadd.f32 %v525_v28, %v497_v34  ;;  %vm587_vm6 = vweird.f32 %v1327_v44 }
  0xd4   : > { %v555_v37 = vmul.f32 %v543_v11, %v537_v26  ;;  %v536_v47 = vadd.f32 %v526_v41, %v495_v38  ;;  %v584_v6 = vsub.f32 1.0, %v583_v62  ;;  %v1243_v38 = vor.u32 %v1298_v35, %v1242_v53  ;;  %v1244_v41 = vld [vmem:[#allocation4 + $0xf8] sm:$0xf0]  ;;  %v1236_v62 = vld [vmem:[#allocation4 + $0xe8] sm:$0xf0] }
  0xd5   : > { %v553_v40 = vmul.f32 %v541_v27, %v535_v31  ;;  %v556_v58 = vmul.f32 %v544_v39, %v538_v42  ;;  %v1170_v42 = vld [vmem:[#allocation4 + $0x60] sm:$0xf] }
  0xd6   : > { %v1611_v46 = vadd.f32 %v555_v37, %v549_v32  ;;  %v554_v59 = vmul.f32 %v542_v43, %v536_v47  ;;  %v585_v12 = vmul.f32 %v1327_v44, %v584_v6  ;;  %v1178_v32 = vld [vmem:[#allocation4 + $0x70] sm:$0xf]  ;;  %v1180_v37 = vld [vmem:[#allocation4 + $0x78] sm:$0xf0]  ;;  %v1296_v47 = vld [vmem:[#allocation4 + $0xe4] sm:$0xf0]  ;;  %915 = vmatpush.bf16.msra.mxu3 %v1243_v38 }
  0xd7   : > { %v1621_v51 = vadd.f32 %v553_v40, %v547_v36  ;;  %v1628_v61 = vadd.f32 %v556_v58, %v550_v48  ;;  %v1179_v34 = vor.u32 %v1282_v33, %v1178_v32  ;;  %v1281_v36 = vld [vmem:[#allocation4 + $0x74] sm:$0xf]  ;;  %v1235_v50 = vor.u32 %v1296_v47, %v1234_v45  ;;  %v1172_v58 = vld [vmem:[#allocation4 + $0x68] sm:$0xf0]  ;;  %v1212_v33 = vld [vmem:[#allocation4 + $0xb8] sm:$0xf0] }
  0xd8   : > { %v565_v0 = vsel %vm564_vm5, %v1611_v46, 0.0  ;;  %v1633_v1 = vadd.f32 %v554_v59, %v548_v57  ;;  %v586_v19 = vadd.f32 %v1327_v44, %v585_v12  ;;  %v1183_v39 = vor.u32 %v1281_v36, %v1180_v37  ;;  %v1297_v40 = vld [vmem:[#allocation4 + $0xf4] sm:$0xf]  ;;  %v1279_v57 = vld [vmem:[#allocation4 + $0x64] sm:$0xf] }
  0xd9   : > { %v563_v60 = vadd.f32 %v1621_v51, %v1616_v49  ;;  %v574_v5 = vsel %vm564_vm5, %v1628_v61, 0.0  ;;  %902 = vmatpush.bf16.msra.mxu2 %v1179_v34  ;;  %v1247_v43 = vor.u32 %v1297_v40, %v1244_v41  ;;  %v1295_v59 = vld [vmem:[#allocation4 + $0xe4] sm:$0xf]  ;;  %v1277_v6 = vld [vmem:[#allocation4 + $0x54] sm:$0xf] }
  0xda   : > { %v573_v3 = vadd.f32 %v1633_v1, %v1630_v63  ;;  %v588_v21 = vsel %vm587_vm6, %v1327_v44, %v586_v19  ;;  %v1280_v44 = vld [vmem:[#allocation4 + $0x64] sm:$0xf0]  ;;  %928 = vmatpush.bf16.msrb.mxu0 %v1183_v39  ;;  %916 = vmatpush.bf16.msra.mxu3 %v1235_v50  ;;  %v1218_v19 = vld [vmem:[#allocation4 + $0xc0] sm:$0xf]  ;;  %v1289_v32 = vld [vmem:[#allocation4 + $0xb4] sm:$0xf] }
  0xdb   : > { %v566_v2 = vadd.f32 %v565_v0, %v563_v60  ;;  %v1171_v48 = vor.u32 %v1280_v44, %v1170_v42  ;;  %941 = vmatpush.bf16.msrb.mxu1 %v1247_v43  ;;  %v1175_v60 = vor.u32 %v1279_v57, %v1172_v58  ;;  %v1162_v0 = vld [vmem:[#allocation4 + $0x50] sm:$0xf]  ;;  %v1138_v36 = vld [vmem:[#allocation4 + $0x20] sm:$0xf]  ;;  %v1272_v37 = vld [vmem:[#allocation4 + $0x24] sm:$0xf0]  ;;  %v1215_v40 = vor.u32 %v1289_v32, %v1212_v33 }
  0xdc   : > { %v575_v7 = vadd.f32 %v574_v5, %v573_v3  ;;  %v1239_v3 = vor.u32 %v1295_v59, %v1236_v62  ;;  %v1294_v5 = vld [vmem:[#allocation4 + $0xd4] sm:$0xf0]  ;;  %v1202_v38 = vld [vmem:[#allocation4 + $0xa0] sm:$0xf]  ;;  %v1288_v41 = vld [vmem:[#allocation4 + $0xa4] sm:$0xf0] }
  0xdd   : > { %v567_v4 = vrot.slane %v566_v2, 4  ;;  %903 = vmatpush.bf16.msra.mxu2 %v1171_v48  ;;  %v1271_v42 = vld [vmem:[#allocation4 + $0x24] sm:$0xf]  ;;  %v1140_v43 = vld [vmem:[#allocation4 + $0x28] sm:$0xf0]  ;;  %v1139_v48 = vor.u32 %v1272_v37, %v1138_v36  ;;  %v1203_v57 = vor.u32 %v1288_v41, %v1202_v38  ;;  %v657_v41 = vrot.slane %v1552_v56, 3 }
  0xde   : > { %v576_v9 = vrot.slane %v575_v7, 4  ;;  %929 = vmatpush.bf16.msrb.mxu0 %v1175_v60  ;;  %v1287_v44 = vld [vmem:[#allocation4 + $0xa4] sm:$0xf]  ;;  %v1204_v45 = vld [vmem:[#allocation4 + $0xa8] sm:$0xf0]  ;;  %v1143_v58 = vor.u32 %v1271_v42, %v1140_v43 }
  0xdf   : > { %v568_v8 = vadd.f32 %v567_v4, %v566_v2  ;;  %v1278_v2 = vld [vmem:[#allocation4 + $0x54] sm:$0xf0]  ;;  %v1226_v4 = vld [vmem:[#allocation4 + $0xd0] sm:$0xf]  ;;  %942 = vmatpush.bf16.msrb.mxu1 %v1239_v3  ;;  %v1269_v3 = vld [vmem:[#allocation4 + $0x14] sm:$0xf] }
  0xe0   : > { %v577_v14 = vadd.f32 %v576_v9, %v575_v7  ;;  %v1163_v7 = vor.u32 %v1278_v2, %v1162_v0  ;;  %v1293_v9 = vld [vmem:[#allocation4 + $0xd4] sm:$0xf]  ;;  %v1227_v12 = vor.u32 %v1294_v5, %v1226_v4  ;;  %v1130_v59 = vld [vmem:[#allocation4 + $0x10] sm:$0xf]  ;;  %v1270_v60 = vld [vmem:[#allocation4 + $0x14] sm:$0xf0]  ;;  %v1207_v0 = vor.u32 %v1287_v44, %v1204_v45 }
  0xe1   : > { %v569_v10 = vrot.slane %v568_v8, 2  ;;  %v1194_v62 = vld [vmem:[#allocation4 + $0x90] sm:$0xf]  ;;  %v1286_v2 = vld [vmem:[#allocation4 + $0x94] sm:$0xf0] }
  0xe2   : > { %v578_v17 = vrot.slane %v577_v14, 2  ;;  %904 = vmatpush.bf16.msra.mxu2 %v1163_v7  ;;  %917 = vmatpush.bf16.msra.mxu3 %v1227_v12  ;;  %v1132_v4 = vld [vmem:[#allocation4 + $0x18] sm:$0xf0]  ;;  %v1285_v5 = vld [vmem:[#allocation4 + $0x94] sm:$0xf]  ;;  %v1131_v7 = vor.u32 %v1270_v60, %v1130_v59  ;;  %v1195_v12 = vor.u32 %v1286_v2, %v1194_v62 }
  0xe3   : > { %v570_v15 = vadd.f32 %v569_v10, %v568_v8  ;;  %v1164_v8 = vld [vmem:[#allocation4 + $0x58] sm:$0xf0] }
  0xe4   : > { %v579_v52 = vadd.f32 %v578_v17, %v577_v14  ;;  %v1228_v10 = vld [vmem:[#allocation4 + $0xd8] sm:$0xf0]  ;;  %v1167_v14 = vor.u32 %v1277_v6, %v1164_v8  ;;  %v1276_v17 = vld [vmem:[#allocation4 + $0x44] sm:$0xf0]  ;;  %v1122_v8 = vld [vmem:[#allocation4] sm:$0xf] }
  0xe5   : > { %v571_v13 = vrot.slane %v570_v15, 1  ;;  %v1196_v6 = vld [vmem:[#allocation4 + $0x98] sm:$0xf0] }
  0xe6   : > { %v580_v20 = vrot.slane %v579_v52, 1  ;;  %930 = vmatpush.bf16.msrb.mxu0 %v1167_v14  ;;  %v1135_v14 = vor.u32 %v1269_v3, %v1132_v4 }
  0xe7   : > { %v572_v22 = vadd.f32 %v571_v13, %v570_v15  ;;  %v1154_v15 = vld [vmem:[#allocation4 + $0x40] sm:$0xf]  ;;  %v1231_v13 = vor.u32 %v1293_v9, %v1228_v10  ;;  %v1268_v9 = vld [vmem:[#allocation4 + $0x4] sm:$0xf0] }
  0xe8   : > { %v581_v23 = vadd.f32 %v580_v20, %v579_v52  ;;  %v1292_v52 = vld [vmem:[#allocation4 + $0xc4] sm:$0xf0]  ;;  %v1275_v20 = vld [vmem:[#allocation4 + $0x44] sm:$0xf]  ;;  %v1186_v10 = vld [vmem:[#allocation4 + $0x80] sm:$0xf] }
  0xe9   : > { %v1640_v11 = vmul.f32 %v588_v21, %v572_v22  ;;  %v1291_v22 = vld [vmem:[#allocation4 + $0xc4] sm:$0xf]  ;;  %943 = vmatpush.bf16.msrb.mxu1 %v1231_v13  ;;  %v1199_v13 = vor.u32 %v1285_v5, %v1196_v6 }
  0xea   : > { %v1638_v24 = vmul.f32 %v588_v21, %v581_v23  ;;  %v1156_v21 = vld [vmem:[#allocation4 + $0x48] sm:$0xf0] }
  0xeb   : > { %v1220_v23 = vld [vmem:[#allocation4 + $0xc8] sm:$0xf0] }
  0xec   : > { %v596_v16 = vrot.slane %v1638_v24, 7 }
  0xee   : > { %v597_v18 = vsel %vm420_vm1, %v1640_v11, %v596_v16  ;;  %v1155_v16 = vor.u32 %v1276_v17, %v1154_v15  ;;  %v1284_v15 = vld [vmem:[#allocation4 + $0x84] sm:$0xf0]  ;;  %v1267_v17 = vld [vmem:[#allocation4 + $0x4] sm:$0xf] }
  0xef   : > { %599 = vst.msk [vmem:[#allocation3 + $0x1] sm:$0x3] %vm1534_vm0, %v597_v18  ;;  %v1219_v18 = vor.u32 %v1292_v52, %v1218_v19  ;;  %v1124_v19 = vld [vmem:[#allocation4 + $0x8] sm:$0xf0]  ;;  %v1283_v52 = vld [vmem:[#allocation4 + $0x84] sm:$0xf] }
  0xf0   : > { %905 = vmatpush.bf16.msra.mxu2 %v1155_v16 }
  0xf1   : > { %918 = vmatpush.bf16.msra.mxu3 %v1219_v18  ;;  %v1123_v18 = vor.u32 %v1268_v9, %v1122_v8 }
  0xf6   : > { %v628_v54 = vld [vmem:[#allocation3 + $0x1] sm:$0x7] }
  0xf7   : > { %v600_v25 = vld [vmem:[#allocation3] sm:$0x7]  ;;  %v630_v26 = vperm.slane %v628_v54, 0  ;;  %v631_v29 = vperm.slane %v628_v54, 1  ;;  %v632_v30 = vperm.slane %v628_v54, 2  ;;  %v1159_v54 = vor.u32 %v1275_v20, %v1156_v21 }
  0xf8   : > { %v604_v27 = vperm.slane %v600_v25, 2  ;;  %v602_v28 = vperm.slane %v600_v25, 0  ;;  %v603_v31 = vperm.slane %v600_v25, 1  ;;  %v1146_v25 = vld [vmem:[#allocation4 + $0x30] sm:$0xf]  ;;  %v618_v21 = vmul.f32 %v1640_v11, %v1547_v55 }
  0xf9   : > { %633 = vrot.lane.b32.xlu1 %v630_v26, %s1383_s6  ;;  %v1274_v26 = vld [vmem:[#allocation4 + $0x34] sm:$0xf0]  ;;  %931 = vmatpush.bf16.msrb.mxu0 %v1159_v54  ;;  %v1188_v20 = vld [vmem:[#allocation4 + $0x88] sm:$0xf0]  ;;  %v1187_v54 = vor.u32 %v1284_v15, %v1186_v10 }
  0xfa   : > { %609 = vrot.lane.b32.xlu2 %v604_v27, %s1384_s7  ;;  %605 = vrot.lane.b32.xlu0 %v602_v28, %s1384_s7  ;;  %v1210_v27 = vld [vmem:[#allocation4 + $0xb0] sm:$0xf]  ;;  %v1223_v28 = vor.u32 %v1291_v22, %v1220_v23  ;;  %v1147_v53 = vor.u32 %v1274_v26, %v1146_v25  ;;  %v619_v22 = vmul.f32 %v1638_v24, %v1552_v56  ;;  %v622_v32 = vrot.slane %v618_v21, 1 }
  0xfb   : > { %v1127_v25 = vor.u32 %v1267_v17, %v1124_v19 }
  0xfc   : > { %944 = vmatpush.bf16.msrb.mxu1 %v1223_v28  ;;  %906 = vmatpush.bf16.msra.mxu2 %v1147_v53  ;;  %v623_v33 = vrot.slane %v619_v22, 1 }
 0x100   : > { %945 = vmatpush.bf16.msrb.mxu1 %v1215_v40  ;;  %907 = vmatpush.bf16.msra.mxu2 %v1139_v48  ;;  %v656_v40 = vrot.slane %v1547_v55, 3 }
 0x101   : > { %635 = vrot.lane.b32.xlu1 %v631_v29, %s1383_s6  ;;  %v1290_v29 = vld [vmem:[#allocation4 + $0xb4] sm:$0xf0] }
 0x102   : > { %637 = vrot.lane.b32.xlu2 %v632_v30, %s1383_s6  ;;  %607 = vrot.lane.b32.xlu0 %v603_v31, %s1384_s7  ;;  %v1273_v30 = vld [vmem:[#allocation4 + $0x34] sm:$0xf]  ;;  %v1148_v31 = vld [vmem:[#allocation4 + $0x38] sm:$0xf0]  ;;  %v1211_v34 = vor.u32 %v1290_v29, %v1210_v27  ;;  %v1191_v29 = vor.u32 %v1283_v52, %v1188_v20 }
 0x103   : > { %v1151_v35 = vor.u32 %v1273_v30, %v1148_v31 }
 0x104   : > { %919 = vmatpush.bf16.msra.mxu3 %v1211_v34  ;;  %946 = vmatpush.bf16.msrb.mxu1 %v1207_v0 }
 0x105   : > { %932 = vmatpush.bf16.msrb.mxu0 %v1151_v35  ;;  %908 = vmatpush.bf16.msra.mxu2 %v1131_v7 }
 0x108   : > { %920 = vmatpush.bf16.msra.mxu3 %v1203_v57  ;;  %947 = vmatpush.bf16.msrb.mxu1 %v1199_v13 }
 0x109   : > { %933 = vmatpush.bf16.msrb.mxu0 %v1143_v58  ;;  %909 = vmatpush.bf16.msra.mxu2 %v1123_v18 }
 0x10c   : > { %921 = vmatpush.bf16.msra.mxu3 %v1195_v12  ;;  %948 = vmatpush.bf16.msrb.mxu1 %v1191_v29 }
 0x10d   : > { %934 = vmatpush.bf16.msrb.mxu0 %v1135_v14 }
 0x110   : > { %922 = vmatpush.bf16.msra.mxu3 %v1187_v54 }
 0x111   : > { %935 = vmatpush.bf16.msrb.mxu0 %v1127_v25 }
 0x154   : > { %v610_v39 = vpop.permute.xlu2 %609 }
 0x15c   : > { %v638_v23 = vpop.permute.xlu2 %637 }
 0x16b   : > { %v634_v47 = vpop.permute.xlu1 %633 }
 0x16c   : > { %v606_v50 = vpop.permute.xlu0 %605 }
 0x173   : > { %v636_v16 = vpop.permute.xlu1 %635 }
 0x174   : > { %v640_v26 = vsel %vm639_vm7, %v634_v47, %v636_v16  ;;  %v641_v27 = vsel %vm639_vm7, %v636_v16, %v638_v23  ;;  %v608_v28 = vpop.permute.xlu0 %607  ;;  %v245_v16 = vld [vmem:[%s1681_s3 + $0x18] sm:$0x1] }
 0x175   : > { %v644_v30 = vmul.f32 %v640_v26, %v1547_v55  ;;  %v645_v31 = vmul.f32 %v641_v27, %v1552_v56  ;;  %v612_v11 = vsel %vm611_vm8, %v606_v50, %v608_v28  ;;  %v613_v24 = vsel %vm611_vm8, %v608_v28, %v610_v39  ;;  %v244_v27 = vld [vmem:[%s1681_s3 + $0x10] sm:$0x1] }
 0x176   : > { %v616_v53 = vmul.f32 %v612_v11, %v1547_v55  ;;  %v617_v34 = vmul.f32 %v613_v24, %v1552_v56 }
 0x177   : > { %v648_v35 = vrot.slane %v644_v30, 2  ;;  %v649_v36 = vrot.slane %v645_v31, 2 }
 0x178   : > { %v626_v37 = vadd.f32 %v622_v32, %v616_v53  ;;  %v627_v38 = vadd.f32 %v623_v33, %v617_v34 }
 0x17a   : > { %v652_v39 = vadd.f32 %v648_v35, %v626_v37  ;;  %v653_v42 = vadd.f32 %v649_v36, %v627_v38 }
 0x17c   : > { %v660_v43 = vadd.f32 %v656_v40, %v652_v39  ;;  %v661_v44 = vadd.f32 %v657_v41, %v653_v42 }
 0x17e   : > { %v1118_v45 = vmul.f32 -1.442695, %v660_v43  ;;  %v1119_v47 = vmul.f32 -1.442695, %v661_v44 }
 0x180   : > { %1328 = vpow2.f32 %v1118_v45 }
 0x181   : > { %1330 = vpow2.f32 %v1119_v47 }
 0x186   : > { %v1329_v48 = vpop.eup %1328 }
 0x187   : > { %v1331_v50 = vpop.eup %1330  ;;  %v668_v57 = vadd.f32 1.0, %v1329_v48 }
 0x188   : > { %v669_v58 = vadd.f32 1.0, %v1331_v50 }
 0x189   : > { %1332 = vrcp.f32 %v668_v57  ;;  %v681_v0 = vand.u32 2147483648, %v668_v57  ;;  %v679_v4 = vand.u32 2147483647, %v668_v57  ;;  %vm675_vm11 = vweird.f32 %v668_v57 }
 0x18a   : > { %1334 = vrcp.f32 %v669_v58  ;;  %v696_v5 = vand.u32 2147483648, %v669_v58  ;;  %v694_v7 = vand.u32 2147483647, %v669_v58  ;;  %vm690_vm13 = vweird.f32 %v669_v58 }
 0x18b   : > { %v682_v9 = vor.u32 1.1754944e-38, %v681_v0  ;;  %vm680_vm14 = vcmp.eq.f32.partialorder %v679_v4, 8.507059e+37 }
 0x18c   : > { %v697_v14 = vor.u32 1.1754944e-38, %v696_v5  ;;  %vm695_vm0 = vcmp.eq.f32.partialorder %v694_v7, 8.507059e+37 }
 0x18f   : > { %v1333_v59 = vpop.eup %1332 }
 0x190   : > { %v1335_v60 = vpop.eup %1334  ;;  %v671_v55 = vmul.f32 %v1333_v59, %v668_v57  ;;  %vm676_vm9 = vweird.f32 %v1333_v59 }
 0x191   : > { %v686_v62 = vmul.f32 %v1335_v60, %v669_v58  ;;  %vm691_vm10 = vweird.f32 %v1335_v60  ;;  %vm677_vm12 = vmor %vm675_vm11, %vm676_vm9 }
 0x192   : > { %v672_v56 = vsub.f32 1.0, %v671_v55  ;;  %vm692_vm15 = vmor %vm690_vm13, %vm691_vm10 }
 0x193   : > { %v687_v2 = vsub.f32 1.0, %v686_v62 }
 0x194   : > { %v673_v3 = vmul.f32 %v1333_v59, %v672_v56 }
 0x195   : > { %v688_v6 = vmul.f32 %v1335_v60, %v687_v2 }
 0x196   : > { %v674_v8 = vadd.f32 %v1333_v59, %v673_v3 }
 0x197   : > { %v689_v10 = vadd.f32 %v1335_v60, %v688_v6 }
 0x198   : > { %v678_v12 = vsel %vm677_vm12, %v1333_v59, %v674_v8 }
 0x199   : > { %v683_v15 = vsel %vm680_vm14, %v682_v9, %v678_v12  ;;  %v693_v17 = vsel %vm692_vm15, %v1335_v60, %v689_v10 }
 0x19a   : > { %v700_v19 = vmul.f32 %v683_v15, %v660_v43  ;;  %v698_v13 = vsel %vm695_vm0, %v697_v14, %v693_v17 }
 0x19b   : > { %v701_v52 = vmul.f32 %v698_v13, %v661_v44 }
 0x19c   : > { %v702_v20 = vpack.c.bf16 %v700_v19, %v700_v19 }
 0x19d   : > { %v703_v21 = vpack.c.bf16 %v701_v52, %v701_v52 }
 0x19e   : > { %v738_v22 = vrot.slane %v702_v20, 2 }
 0x19f   : > { %v739_v23 = vrot.slane %v703_v21, 2 }
 0x1a0   : > { %910 = vmatmul.bf16.vlgmr.msra.gmra.mxu2 %v738_v22  ;;  %936 = vmatmul.bf16.vlgmr.msrb.gmra.mxu0 %v738_v22 }
 0x1a1   : > { %923 = vmatmul.bf16.vlgmr.msra.gmra.mxu3 %v739_v23  ;;  %949 = vmatmul.bf16.vlgmr.msrb.gmra.mxu1 %v739_v23 }
 0x21d   : > { %v937_v18 = vpop.f32.mrf.mxu0 }
 0x21e   : > { %v938_v54 = vadd.f32 %v937_v18, %v245_v16  ;;  %v950_v25 = vpop.f32.mrf.mxu1 }
 0x220   : > { %v951_v26 = vadd.f32 %v950_v25, %v938_v54 }
 0x222   : > { %v955_v28 = vperm.slane %v951_v26, 0 }
 0x223   : > { %v911_v29 = vpop.f32.mrf.mxu2 }
 0x224   : > { %v912_v30 = vadd.f32 %v911_v29, %v244_v27  ;;  %v924_v31 = vpop.f32.mrf.mxu3  ;;  %v957_v33 = vadd.f32 %v955_v28, %v1630_v63  ;;  %v959_v53 = vadd.f32 %v955_v28, %v1633_v1  ;;  %v961_v34 = vadd.f32 %v955_v28, %v1628_v61 }
 0x225   : > { %v939_v11 = vpop.f32.mrf.mxu0 }
 0x226   : > { %v925_v24 = vadd.f32 %v924_v31, %v912_v30  ;;  %v952_v32 = vpop.f32.mrf.mxu1  ;;  %v963_v40 = vmax.f32 %v957_v33, 0.0  ;;  %v965_v41 = vmax.f32 %v959_v53, 0.0  ;;  %v967_v42 = vmax.f32 %v961_v34, 0.0 }
 0x228   : > { %v954_v35 = vperm.slane %v925_v24, 0 }
 0x22a   : > { %v956_v36 = vadd.f32 %v954_v35, %v1616_v49  ;;  %v958_v37 = vadd.f32 %v954_v35, %v1621_v51  ;;  %v960_v38 = vadd.f32 %v954_v35, %v1611_v46 }
 0x22b   : > { %v913_v39 = vpop.f32.mrf.mxu2 }
 0x22c   : > { %v962_v43 = vmax.f32 %v956_v36, 0.0  ;;  %v964_v44 = vmax.f32 %v958_v37, 0.0  ;;  %v966_v45 = vmax.f32 %v960_v38, 0.0  ;;  %v926_v63 = vpop.f32.mrf.mxu3 }
 0x22e   : > { %v968_v61 = vpack.c.bf16 %v963_v40, %v962_v43  ;;  %v969_v1 = vpack.c.bf16 %v965_v41, %v964_v44  ;;  %v970_v47 = vpack.c.bf16 %v967_v42, %v966_v45 }
 0x230   : > { %971 = vst [vmem:[%s241_s15] sm:$0xff] %v968_v61 }
 0x231   : > { %972 = vst [vmem:[%s241_s15 + $0x8] sm:$0xff] %v969_v1 }
 0x232   : > { %973 = vst [vmem:[%s241_s15 + $0x10] sm:$0x33] %v970_v47 }
 0x233 PF: > { %s16_s18 = sadd.s32 1, %s1376_s18  }
 0x234   : > { %p13_p7 = scmp.ge.s32.totalorder %s16_s18, 4  }
 0x236   :  { %15 = sbr.rel (!%p13_p7) target bundleno = 1 (0x1), region = 76 }
 0x23b   :  { %995 = vsyncpa [#allocation5], 1 }
 0x23c   :  { %997 = vsyncpa [#allocation5 + $0x1], 1 }

</bundles_post_ra>
